<compile_context>
chip_gen: v5e
topology: v5e:2x2
jax: 0.10.0
libtpu: 0.0.40
codegen_flags: <defaults>
</compile_context>

<pallas_src>
import jax
import jax.numpy as jnp
from jax.experimental import pallas as pl
from jax.experimental.pallas import tpu as pltpu

_SCALES = (2, 4, 8, 16)  # upsample factors for d1, d3, d4, d5


def _branch_contrib(x_ref, r_ref, w_ref):
    """Contribution of one branch: W_b @ nearest_upsample(x_b), all as 2-D MXU dots.

    x_ref: (Cb, mb)   low-res tile, spatial flattened on lanes (mb = (TH/s)*(W/s))
    r_ref: (mb, M)    0/1 replication matrix mapping low-res -> high-res flat index
    w_ref: (P, Cb)    slice of the 1x1-conv weight for this branch's channels
    returns (P, M) float32
    """
    x = x_ref[...]
    r = r_ref[...]
    w = w_ref[...]
    cb, mb = x.shape
    p = w.shape[0]
    if mb == 1:
        # 1x1 low-res map: upsample is an outer-product broadcast (pure VPU).
        up = x * r                                            # (Cb, M)
        return jnp.dot(w, up, preferred_element_type=jnp.float32)
    if cb <= p:
        # Upsample first (fewer FLOPs when the branch has few channels).
        up = jnp.dot(x, r, preferred_element_type=x.dtype)    # exact 0/1 selection
        return jnp.dot(w, up, preferred_element_type=jnp.float32)
    # Contract channels first, then replicate the (P, mb) result.
    low = jnp.dot(w, x, preferred_element_type=jnp.float32)
    return jnp.dot(low, r, preferred_element_type=jnp.float32)


def _res_mlp_s_kernel(x1, x2, x3, x4, r1, r2, r3, r4, w1, w2, w3, w4, b_ref, o_ref):
    acc = _branch_contrib(x1, r1, w1)
    acc += _branch_contrib(x2, r2, w2)
    acc += _branch_contrib(x3, r3, w3)
    acc += _branch_contrib(x4, r4, w4)
    o_ref[...] = (acc + b_ref[...].astype(jnp.float32)).astype(o_ref.dtype)


def _vmem_tile_bytes(th, W, P, chans, scales):
    """Single-copy VMEM bytes for one grid step (f32, conservative)."""
    m = th * W
    total = P * m * 4 + P * 4
    for c, s in zip(chans, scales):
        mb = (th // s) * (W // s)
        total += c * mb * 4          # low-res input tile
        total += mb * m * 4          # replication matrix (resident, grid-invariant)
        total += P * c * 4           # weight slice
    return total


def _choose_row_tile(H, W, P, chans, scales, budget_bytes):
    """Largest legal output-row tile whose (double-buffered) footprint fits the budget."""
    smax = max(scales)
    cands = {t for t in range(smax, H + 1, smax) if H % t == 0} | {H}
    valid = []
    for th in sorted(cands, reverse=True):
        if th == H:
            valid.append(th)         # full-extent blocks are always legal
            continue
        if th % smax != 0 or (th * W) % 128 != 0:
            continue
        if any(((th // s) * (W // s)) % 128 != 0 for s in scales):
            continue
        valid.append(th)
    for th in valid:                 # descending: prefer the biggest tile that fits
        if 2 * _vmem_tile_bytes(th, W, P, chans, scales) <= budget_bytes:
            return th
    return valid[-1]


def res_mlp_s_forward(outputs, weight, bias, *,
                      stream_dtype=jnp.float32,
                      tile_vmem_budget_bytes=16 * 1024 * 1024):
    """Pallas ResMlpS forward.

    outputs: dict with 'd1','d3','d4','d5' NCHW arrays (spatial ratio 8:4:2:1).
    weight:  (P, Cin, 1, 1) 1x1-conv weight (PyTorch layout), Cin = sum of branch channels.
    bias:    (P,)
    returns: (N, P, H, W) float32, NCHW, H = 2 * H_d1 (matches PyTorch).
    """
    d_list = [outputs['d1'], outputs['d3'], outputs['d4'], outputs['d5']]
    N = d_list[0].shape[0]
    H = d_list[0].shape[2] * _SCALES[0]
    W = d_list[0].shape[3] * _SCALES[0]
    chans = [d.shape[1] for d in d_list]
    Cin = sum(chans)
    P = weight.shape[0]

    for d, s in zip(d_list, _SCALES):
        assert d.shape[0] == N and d.shape[2] * s == H and d.shape[3] * s == W, (
            "branch spatial shapes must be H/2, H/4, H/8, H/16")
    assert weight.shape == (P, Cin, 1, 1), weight.shape
    assert bias.shape == (P,), bias.shape

    TH = _choose_row_tile(H, W, P, chans, _SCALES, tile_vmem_budget_bytes)
    M_tile = TH * W
    grid = (N, H // TH)

    # Low-res inputs: free contiguous reshape (N, C, h, w) -> (N, C, h*w); no transposes.
    xs = [d.reshape(N, d.shape[1], (H // s) * (W // s)).astype(stream_dtype)
          for d, s in zip(d_list, _SCALES)]

    # Per-branch 0/1 replication matrices mapping tile-local low-res flat index -> high-res.
    rs = []
    m_idx = jnp.arange(M_tile)
    for s in _SCALES:
        wb = W // s
        thb = TH // s
        low_of_m = (m_idx // W // s) * wb + (m_idx % W) // s          # (M_tile,)
        q = jnp.arange(thb * wb)
        rs.append((q[:, None] == low_of_m[None, :]).astype(stream_dtype))

    # Weight slices per branch (P, Cb), matching the channel-concat order; bias as (P, 1).
    w2d = weight[:, :, 0, 0].astype(stream_dtype)
    ws, off = [], 0
    for c in chans:
        ws.append(w2d[:, off:off + c])
        off += c
    b2 = bias.reshape(P, 1).astype(jnp.float32)

    in_specs = []
    for d, s in zip(d_list, _SCALES):
        mb = (TH // s) * (W // s)
        in_specs.append(pl.BlockSpec((None, d.shape[1], mb), lambda n, i: (n, 0, i)))
    for s in _SCALES:
        mb = (TH // s) * (W // s)
        in_specs.append(pl.BlockSpec((mb, M_tile), lambda n, i: (0, 0)))
    for c in chans:
        in_specs.append(pl.BlockSpec((P, c), lambda n, i: (0, 0)))
    in_specs.append(pl.BlockSpec((P, 1), lambda n, i: (0, 0)))

    out_spec = pl.BlockSpec((None, P, M_tile), lambda n, i: (n, 0, i))

    out_flat = pl.pallas_call(
        _res_mlp_s_kernel,
        out_shape=jax.ShapeDtypeStruct((N, P, H * W), jnp.float32),
        grid_spec=pltpu.PrefetchScalarGridSpec(
            num_scalar_prefetch=0,
            grid=grid,
            in_specs=in_specs,
            out_specs=out_spec,
        ),
        compiler_params=pltpu.CompilerParams(
            dimension_semantics=("parallel", "parallel"),
            vmem_limit_bytes=48 * 1024 * 1024,   # fits v7x's 64 MiB physical VMEM
        ),
    )(*xs, *rs, *ws, b2)

    return out_flat.reshape(N, P, H, W)          # free reshape, already NCHW


def _reference_forward(outputs, weight, bias):
    # Pure-JAX reference of the PyTorch forward (NCHW), for verification only.
    def up(x, s):
        x = jnp.repeat(x, s, axis=2)
        return jnp.repeat(x, s, axis=3)
    fm = jnp.concatenate([up(outputs['d1'], 2), up(outputs['d3'], 4),
                          up(outputs['d4'], 8), up(outputs['d5'], 16)], axis=1)
    w2d = weight[:, :, 0, 0]
    return jnp.einsum('pc,nchw->nphw', w2d, fm) + bias[None, :, None, None]


if __name__ == "__main__":
    key = jax.random.PRNGKey(0)
    k1, k3, k4, k5, kw, kb = jax.random.split(key, 6)

    # Small shapes: 4 channels per branch; all branches upsample to a 16x16 output.
    d1 = jax.random.normal(k1, (2, 4, 8, 8), dtype=jnp.float32)
    d3 = jax.random.normal(k3, (2, 4, 4, 4), dtype=jnp.float32)
    d4 = jax.random.normal(k4, (2, 4, 2, 2), dtype=jnp.float32)
    d5 = jax.random.normal(k5, (2, 4, 1, 1), dtype=jnp.float32)
    outputs = {'d1': d1, 'd3': d3, 'd4': d4, 'd5': d5}

    in_channels = 4 + 4 + 4 + 4
    projection_size = 8
    mlp_hidden_size = 32  # TODO(synk): unused by the PyTorch forward (no MLP layer is applied)

    weight = 0.1 * jax.random.normal(
        kw, (projection_size, in_channels, 1, 1), dtype=jnp.float32)
    bias = 0.1 * jax.random.normal(kb, (projection_size,), dtype=jnp.float32)

    out = jax.block_until_ready(res_mlp_s_forward(outputs, weight, bias))
    ref = _reference_forward(outputs, weight, bias)

    assert out.shape == (2, projection_size, 16, 16), out.shape
    assert jnp.allclose(out, ref, atol=1e-5, rtol=1e-5), \
        float(jnp.max(jnp.abs(out - ref)))

    print("KERNEL_OK")
</pallas_src>

<mosaic_0001>
module attributes {stable_mosaic.version = 11 : i64} {
  func.func @_res_mlp_s_kernel(%arg0: i32, %arg1: i32, %arg2: memref<1x4x64xf32, #tpu.memory_space<vmem>>, %arg3: memref<1x4x16xf32, #tpu.memory_space<vmem>>, %arg4: memref<1x4x4xf32, #tpu.memory_space<vmem>>, %arg5: memref<1x4x1xf32, #tpu.memory_space<vmem>>, %arg6: memref<64x256xf32, #tpu.memory_space<vmem>>, %arg7: memref<16x256xf32, #tpu.memory_space<vmem>>, %arg8: memref<4x256xf32, #tpu.memory_space<vmem>>, %arg9: memref<1x256xf32, #tpu.memory_space<vmem>>, %arg10: memref<8x4xf32, #tpu.memory_space<vmem>>, %arg11: memref<8x4xf32, #tpu.memory_space<vmem>>, %arg12: memref<8x4xf32, #tpu.memory_space<vmem>>, %arg13: memref<8x4xf32, #tpu.memory_space<vmem>>, %arg14: memref<8x1xf32, #tpu.memory_space<vmem>>, %arg15: memref<1x8x256xf32, #tpu.memory_space<vmem>>) attributes {dimension_semantics = [#tpu.dimension_semantics<parallel>, #tpu.dimension_semantics<parallel>], iteration_bounds = array<i64: 2, 1>, scalar_prefetch = 0 : i64, scratch_operands = 0 : i64, tpu.core_type = #tpu.core_type<tc>, window_params = [{transform_indices = @transform_0, window_bounds = array<i64: 1, 4, 64>}, {transform_indices = @transform_1, window_bounds = array<i64: 1, 4, 16>}, {transform_indices = @transform_2, window_bounds = array<i64: 1, 4, 4>}, {transform_indices = @transform_3, window_bounds = array<i64: 1, 4, 1>}, {pipeline_mode = #tpu.pipeline_mode<synchronous>, transform_indices = @transform_4, window_bounds = array<i64: 64, 256>}, {pipeline_mode = #tpu.pipeline_mode<synchronous>, transform_indices = @transform_5, window_bounds = array<i64: 16, 256>}, {pipeline_mode = #tpu.pipeline_mode<synchronous>, transform_indices = @transform_6, window_bounds = array<i64: 4, 256>}, {pipeline_mode = #tpu.pipeline_mode<synchronous>, transform_indices = @transform_7, window_bounds = array<i64: 1, 256>}, {pipeline_mode = #tpu.pipeline_mode<synchronous>, transform_indices = @transform_8, window_bounds = array<i64: 8, 4>}, {pipeline_mode = #tpu.pipeline_mode<synchronous>, transform_indices = @transform_9, window_bounds = array<i64: 8, 4>}, {pipeline_mode = #tpu.pipeline_mode<synchronous>, transform_indices = @transform_10, window_bounds = array<i64: 8, 4>}, {pipeline_mode = #tpu.pipeline_mode<synchronous>, transform_indices = @transform_11, window_bounds = array<i64: 8, 4>}, {pipeline_mode = #tpu.pipeline_mode<synchronous>, transform_indices = @transform_12, window_bounds = array<i64: 8, 1>}, {transform_indices = @transform_13, window_bounds = array<i64: 1, 8, 256>}]} {
    %c0 = arith.constant 0 : index
    %c0_0 = arith.constant 0 : index
    %c0_1 = arith.constant 0 : index
    %0 = vector.load %arg2[%c0, %c0_0, %c0_1] : memref<1x4x64xf32, #tpu.memory_space<vmem>>, vector<1x4x64xf32>
    %1 = vector.shape_cast %0 : vector<1x4x64xf32> to vector<4x64xf32>
    %c0_2 = arith.constant 0 : index
    %c0_3 = arith.constant 0 : index
    %2 = vector.load %arg6[%c0_2, %c0_3] : memref<64x256xf32, #tpu.memory_space<vmem>>, vector<64x256xf32>
    %c0_4 = arith.constant 0 : index
    %c0_5 = arith.constant 0 : index
    %3 = vector.load %arg10[%c0_4, %c0_5] : memref<8x4xf32, #tpu.memory_space<vmem>>, vector<8x4xf32>
    %cst = arith.constant dense<0.000000e+00> : vector<4x256xf32>
    %4 = tpu.matmul %1, %2, %cst {dimension_numbers = #tpu.dot_dimension_numbers<[1], [0], [0], [1], [0, 0, 1, 1], [], []>} : vector<4x64xf32>, vector<64x256xf32>, vector<4x256xf32> -> vector<4x256xf32>
    %cst_6 = arith.constant dense<0.000000e+00> : vector<8x256xf32>
    %5 = tpu.matmul %3, %4, %cst_6 {dimension_numbers = #tpu.dot_dimension_numbers<[1], [0], [0], [1], [0, 0, 1, 1], [], []>} : vector<8x4xf32>, vector<4x256xf32>, vector<8x256xf32> -> vector<8x256xf32>
    %c0_7 = arith.constant 0 : index
    %c0_8 = arith.constant 0 : index
    %c0_9 = arith.constant 0 : index
    %6 = vector.load %arg3[%c0_7, %c0_8, %c0_9] : memref<1x4x16xf32, #tpu.memory_space<vmem>>, vector<1x4x16xf32>
    %7 = vector.shape_cast %6 : vector<1x4x16xf32> to vector<4x16xf32>
    %c0_10 = arith.constant 0 : index
    %c0_11 = arith.constant 0 : index
    %8 = vector.load %arg7[%c0_10, %c0_11] : memref<16x256xf32, #tpu.memory_space<vmem>>, vector<16x256xf32>
    %c0_12 = arith.constant 0 : index
    %c0_13 = arith.constant 0 : index
    %9 = vector.load %arg11[%c0_12, %c0_13] : memref<8x4xf32, #tpu.memory_space<vmem>>, vector<8x4xf32>
    %cst_14 = arith.constant dense<0.000000e+00> : vector<4x256xf32>
    %10 = tpu.matmul %7, %8, %cst_14 {dimension_numbers = #tpu.dot_dimension_numbers<[1], [0], [0], [1], [0, 0, 1, 1], [], []>} : vector<4x16xf32>, vector<16x256xf32>, vector<4x256xf32> -> vector<4x256xf32>
    %cst_15 = arith.constant dense<0.000000e+00> : vector<8x256xf32>
    %11 = tpu.matmul %9, %10, %cst_15 {dimension_numbers = #tpu.dot_dimension_numbers<[1], [0], [0], [1], [0, 0, 1, 1], [], []>} : vector<8x4xf32>, vector<4x256xf32>, vector<8x256xf32> -> vector<8x256xf32>
    %12 = arith.addf %5, %11 : vector<8x256xf32>
    %c0_16 = arith.constant 0 : index
    %c0_17 = arith.constant 0 : index
    %c0_18 = arith.constant 0 : index
    %13 = vector.load %arg4[%c0_16, %c0_17, %c0_18] : memref<1x4x4xf32, #tpu.memory_space<vmem>>, vector<1x4x4xf32>
    %14 = vector.shape_cast %13 : vector<1x4x4xf32> to vector<4x4xf32>
    %c0_19 = arith.constant 0 : index
    %c0_20 = arith.constant 0 : index
    %15 = vector.load %arg8[%c0_19, %c0_20] : memref<4x256xf32, #tpu.memory_space<vmem>>, vector<4x256xf32>
    %c0_21 = arith.constant 0 : index
    %c0_22 = arith.constant 0 : index
    %16 = vector.load %arg12[%c0_21, %c0_22] : memref<8x4xf32, #tpu.memory_space<vmem>>, vector<8x4xf32>
    %cst_23 = arith.constant dense<0.000000e+00> : vector<4x256xf32>
    %17 = tpu.matmul %14, %15, %cst_23 {dimension_numbers = #tpu.dot_dimension_numbers<[1], [0], [0], [1], [0, 0, 1, 1], [], []>} : vector<4x4xf32>, vector<4x256xf32>, vector<4x256xf32> -> vector<4x256xf32>
    %cst_24 = arith.constant dense<0.000000e+00> : vector<8x256xf32>
    %18 = tpu.matmul %16, %17, %cst_24 {dimension_numbers = #tpu.dot_dimension_numbers<[1], [0], [0], [1], [0, 0, 1, 1], [], []>} : vector<8x4xf32>, vector<4x256xf32>, vector<8x256xf32> -> vector<8x256xf32>
    %19 = arith.addf %12, %18 : vector<8x256xf32>
    %c0_25 = arith.constant 0 : index
    %c0_26 = arith.constant 0 : index
    %c0_27 = arith.constant 0 : index
    %20 = vector.load %arg5[%c0_25, %c0_26, %c0_27] : memref<1x4x1xf32, #tpu.memory_space<vmem>>, vector<1x4x1xf32>
    %21 = vector.shape_cast %20 : vector<1x4x1xf32> to vector<4x1xf32>
    %c0_28 = arith.constant 0 : index
    %c0_29 = arith.constant 0 : index
    %22 = vector.load %arg9[%c0_28, %c0_29] : memref<1x256xf32, #tpu.memory_space<vmem>>, vector<1x256xf32>
    %c0_30 = arith.constant 0 : index
    %c0_31 = arith.constant 0 : index
    %23 = vector.load %arg13[%c0_30, %c0_31] : memref<8x4xf32, #tpu.memory_space<vmem>>, vector<8x4xf32>
    %24 = vector.broadcast %21 : vector<4x1xf32> to vector<4x256xf32>
    %25 = vector.broadcast %22 : vector<1x256xf32> to vector<4x256xf32>
    %26 = arith.mulf %24, %25 : vector<4x256xf32>
    %cst_32 = arith.constant dense<0.000000e+00> : vector<8x256xf32>
    %27 = tpu.matmul %23, %26, %cst_32 {dimension_numbers = #tpu.dot_dimension_numbers<[1], [0], [0], [1], [0, 0, 1, 1], [], []>} : vector<8x4xf32>, vector<4x256xf32>, vector<8x256xf32> -> vector<8x256xf32>
    %28 = arith.addf %19, %27 : vector<8x256xf32>
    %c0_33 = arith.constant 0 : index
    %c0_34 = arith.constant 0 : index
    %29 = vector.load %arg14[%c0_33, %c0_34] : memref<8x1xf32, #tpu.memory_space<vmem>>, vector<8x1xf32>
    %30 = vector.broadcast %29 : vector<8x1xf32> to vector<8x256xf32>
    %31 = arith.addf %28, %30 : vector<8x256xf32>
    %c0_35 = arith.constant 0 : index
    %c0_36 = arith.constant 0 : index
    %c0_37 = arith.constant 0 : index
    %32 = vector.load %arg15[%c0_35, %c0_36, %c0_37] : memref<1x8x256xf32, #tpu.memory_space<vmem>>, vector<1x8x256xf32>
    %33 = vector.shape_cast %32 : vector<1x8x256xf32> to vector<8x256xf32>
    %34 = vector.shape_cast %31 : vector<8x256xf32> to vector<1x8x256xf32>
    tpu.vector_store %arg15[%c0_35, %c0_36, %c0_37], %34 {strides = array<i32>} : memref<1x8x256xf32, #tpu.memory_space<vmem>>, vector<1x8x256xf32>,
    return
  }
  func.func @transform_0(%arg0: i32, %arg1: i32) -> (i32, i32, i32) {
    %c0_i32 = arith.constant 0 : i32
    %c0_i32_0 = arith.constant 0 : i32
    return %arg0, %c0_i32, %arg1 : i32, i32, i32
  }
  func.func @transform_1(%arg0: i32, %arg1: i32) -> (i32, i32, i32) {
    %c0_i32 = arith.constant 0 : i32
    %c0_i32_0 = arith.constant 0 : i32
    return %arg0, %c0_i32, %arg1 : i32, i32, i32
  }
  func.func @transform_2(%arg0: i32, %arg1: i32) -> (i32, i32, i32) {
    %c0_i32 = arith.constant 0 : i32
    %c0_i32_0 = arith.constant 0 : i32
    return %arg0, %c0_i32, %arg1 : i32, i32, i32
  }
  func.func @transform_3(%arg0: i32, %arg1: i32) -> (i32, i32, i32) {
    %c0_i32 = arith.constant 0 : i32
    %c0_i32_0 = arith.constant 0 : i32
    return %arg0, %c0_i32, %arg1 : i32, i32, i32
  }
  func.func @transform_4(%arg0: i32, %arg1: i32) -> (i32, i32) {
    %c0_i32 = arith.constant 0 : i32
    %c0_i32_0 = arith.constant 0 : i32
    %c0_i32_1 = arith.constant 0 : i32
    return %c0_i32, %c0_i32_0 : i32, i32
  }
  func.func @transform_5(%arg0: i32, %arg1: i32) -> (i32, i32) {
    %c0_i32 = arith.constant 0 : i32
    %c0_i32_0 = arith.constant 0 : i32
    %c0_i32_1 = arith.constant 0 : i32
    return %c0_i32, %c0_i32_0 : i32, i32
  }
  func.func @transform_6(%arg0: i32, %arg1: i32) -> (i32, i32) {
    %c0_i32 = arith.constant 0 : i32
    %c0_i32_0 = arith.constant 0 : i32
    %c0_i32_1 = arith.constant 0 : i32
    return %c0_i32, %c0_i32_0 : i32, i32
  }
  func.func @transform_7(%arg0: i32, %arg1: i32) -> (i32, i32) {
    %c0_i32 = arith.constant 0 : i32
    %c0_i32_0 = arith.constant 0 : i32
    %c0_i32_1 = arith.constant 0 : i32
    return %c0_i32, %c0_i32_0 : i32, i32
  }
  func.func @transform_8(%arg0: i32, %arg1: i32) -> (i32, i32) {
    %c0_i32 = arith.constant 0 : i32
    %c0_i32_0 = arith.constant 0 : i32
    %c0_i32_1 = arith.constant 0 : i32
    return %c0_i32, %c0_i32_0 : i32, i32
  }
  func.func @transform_9(%arg0: i32, %arg1: i32) -> (i32, i32) {
    %c0_i32 = arith.constant 0 : i32
    %c0_i32_0 = arith.constant 0 : i32
    %c0_i32_1 = arith.constant 0 : i32
    return %c0_i32, %c0_i32_0 : i32, i32
  }
  func.func @transform_10(%arg0: i32, %arg1: i32) -> (i32, i32) {
    %c0_i32 = arith.constant 0 : i32
    %c0_i32_0 = arith.constant 0 : i32
    %c0_i32_1 = arith.constant 0 : i32
    return %c0_i32, %c0_i32_0 : i32, i32
  }
  func.func @transform_11(%arg0: i32, %arg1: i32) -> (i32, i32) {
    %c0_i32 = arith.constant 0 : i32
    %c0_i32_0 = arith.constant 0 : i32
    %c0_i32_1 = arith.constant 0 : i32
    return %c0_i32, %c0_i32_0 : i32, i32
  }
  func.func @transform_12(%arg0: i32, %arg1: i32) -> (i32, i32) {
    %c0_i32 = arith.constant 0 : i32
    %c0_i32_0 = arith.constant 0 : i32
    %c0_i32_1 = arith.constant 0 : i32
    return %c0_i32, %c0_i32_0 : i32, i32
  }
  func.func @transform_13(%arg0: i32, %arg1: i32) -> (i32, i32, i32) {
    %c0_i32 = arith.constant 0 : i32
    %c0_i32_0 = arith.constant 0 : i32
    return %arg0, %c0_i32, %arg1 : i32, i32, i32
  }
}

</mosaic_0001>

<bundles_post_ra>
// kernel: tpu_custom_call.1
= control target key start
LH: loop header
LB: loop body
LE: loop exit
PB: predicated region body
PF: predicated region fallthrough
CT: control target
= control target key end

     0   :  { %18 = vsyncpa [#allocation3], 0  ;;  %s1660_s0 = inlined_call_operand.vmem [shape: f32[2,4,64], index: 0, kind: input, shape index: {}]   ;;  %s1661_s1 = inlined_call_operand.vmem [shape: f32[2,4,16], index: 1, kind: input, shape index: {}]   ;;  %s1662_s2 = inlined_call_operand.vmem [shape: f32[2,4,4], index: 2, kind: input, shape index: {}]   ;;  %s1663_s3 = inlined_call_operand.vmem [shape: f32[2,4,1], index: 3, kind: input, shape index: {}]   ;;  %s1664_s4 = inlined_call_operand.hbm [shape: f32[64,256], index: 4, kind: input, shape index: {}]   ;;  %s1665_s5 = inlined_call_operand.hbm [shape: f32[16,256], index: 5, kind: input, shape index: {}]   ;;  %s1666_s6 = inlined_call_operand.vmem [shape: f32[4,256], index: 6, kind: input, shape index: {}]   ;;  %s1667_s7 = inlined_call_operand.vmem [shape: f32[1,256], index: 7, kind: input, shape index: {}]   ;;  %s1668_s8 = inlined_call_operand.vmem [shape: f32[8,4], index: 8, kind: input, shape index: {}]   ;;  %s1669_s9 = inlined_call_operand.vmem [shape: f32[8,4], index: 9, kind: input, shape index: {}]   ;;  %s1670_s10 = inlined_call_operand.vmem [shape: f32[8,4], index: 10, kind: input, shape index: {}]   ;;  %s1671_s11 = inlined_call_operand.vmem [shape: f32[8,4], index: 11, kind: input, shape index: {}]   ;;  %s1672_s12 = inlined_call_operand.vmem [shape: f32[8,1], index: 12, kind: input, shape index: {}]   ;;  %s1673_s13 = inlined_call_operand.hbm [shape: f32[2,8,256], index: 13, kind: output, shape index: {}]  }
   0x1   :  { %19 = vsyncpa [#allocation6], 0 }
   0x2   :  { %20 = vsyncpa [#allocation4], 0 }
   0x3   :  { %22 = vsyncpa [#allocation4 + $0x1], 0  ;;  %s1479_s25 = smov 0   ;;  %s1481_s26 = smov 0  }
   0x4   :  { %s1483_s27 = smov 0   ;;  %s1485_s28 = smov 0  }
   0x5   :  { %s1487_s29 = smov 0   ;;  %s1489_s30 = smov 0  }
   0x6 LB: > { %1679 = sst [smem:[#allocation11_spill]] %s1382_s25  ;;  %s1132_s14 = sadd.s32 4294967295, %s1402_s30   ;;  %s1402_s30 = sphi %s1489_s30, %s28_s30   ;;  %s1398_s29 = sphi %s1487_s29, %s1694_s29   ;;  %s1394_s28 = sphi %s1485_s28, %s1693_s28   ;;  %s1390_s27 = sphi %s1483_s27, %s1692_s27   ;;  %s1386_s26 = sphi %s1481_s26, %s1696_s26   ;;  %s1382_s25 = sphi %s1479_s25, %s1695_s25  }
   0x7   : > { %1680 = sst [smem:[#allocation12_spill]] %s1390_s27  ;;  %s1133_s15 = sadd.s32 4294967294, %s1402_s30  }
   0x8   : > { %1681 = sst [smem:[#allocation13_spill]] %s1398_s29  ;;  %s40_s16 = sadd.s32 1, %s1398_s29 }
   0x9   : > { %s350_s17 = sadd.s32 1, %s1390_s27  ;;  %p42_p0 = scmp.ge.s32.totalorder %s40_s16, 2 }
   0xa   : > { %p360_p1 = scmp.ne.s32.totalorder %s1390_s27, %s1386_s26  ;;  %p361_p2 = scmp.eq.s32.totalorder %s1132_s14, 1 }
   0xb   : > { %p366_p3 = scmp.ne.s32.totalorder %s1386_s26, %s1382_s25  ;;  %s1698_s16 = smov (%p42_p0, %s40_s16), 0 }
   0xc   : > { %1682 = sst [smem:[#allocation14_spill]] %s1698_s16  ;;  %p1519_p4 = por %p361_p2, %p360_p1 }
   0xd   : > { %p367_p5 = scmp.eq.s32.totalorder %s1133_s15, 1  ;;  %s345_s19 = ssub.s32 %s1398_s29, %s1698_s16 }
   0xe   : > { %p1134_p6 = scmp.ge.s32.totalorder %s1402_s30, 1  ;;  %p348_p7 = scmp.eq.s32.totalorder %s345_s19, 0 }
   0xf   : > { %p1526_p8 = por %p367_p5, %p366_p3  ;;  %p374_p9 = scmp.lt.s32.totalorder %s1402_s30, 3 }
  0x10   : > { %s1532_s21 = scalar_select %p348_p7, %s1390_s27, %s350_s17  }
  0x11   : > { %s1684_s20 = scalar_select %p1526_p8, 1, 0 }
  0x12   : > { %1686 = sst [smem:[#allocation16_spill]] %s1532_s21  ;;  %p1534_p10 = pnand %p1134_p6, %p374_p9 }
  0x13   : > { %1685 = sst [smem:[#allocation15_spill]] %s1684_s20  ;;  %p1538_p11 = scmp.eq.s32.totalorder %s1132_s14, 0 }
  0x14   : > { %s385_s19 = sshll.u32 %s1664_s4, 4  ;;  %p1186_p12 = pneg %p1534_p10  ;;  %s386_s19 = int_to_ptr.hbm [resolvable:$true] %s385_s19 }
  0x15   : > { %s1404_s16 = smov [#allocation2]   ;;  %s399_s14 = sshll.u32 %s1665_s5, 4  ;;  %s400_s14 = int_to_ptr.hbm [resolvable:$true] %s399_s14 }
  0x16   : > { %s387_s17 = sshll.u32 %s1404_s16, 4  ;;  %p1187_p13 = pnand %p1538_p11, %p1186_p12  ;;  %s388_s17 = int_to_ptr.vmem [resolvable:$true] %s387_s17 }
  0x17   : > { %s1405_s27 = smov 256   ;;  %s1406_s20 = smov 16  }
  0x18   : > { %1189 = dma.hbm_to_vmem [thread:$0]  (!%p1187_p13), %s386_s19, 2048, %s388_s17, [#allocation3], %s1405_s27, %s1405_s27, %s1406_s20  }
  0x19   : > { %s1407_s25 = smov [#allocation5]   ;;  %478 = sbr.rel (%p1534_p10) target bundleno = 331 (0x14b), region = 72 }
  0x1a   : > { %s401_s24 = sshll.u32 %s1407_s25, 4  ;;  %s402_s24 = int_to_ptr.vmem [resolvable:$true] %s401_s24 }
  0x1b   : > { %1192 = dma.hbm_to_vmem [thread:$0]  (!%p1187_p13), %s400_s14, 512, %s402_s24, [#allocation6], %s1405_s27, %s1405_s27, %s1406_s20  }
  0x1e   : > { %1369 = dma.done.wait (%p1538_p11), [#allocation3], 2048  }
  0x1f   : > { %1371 = vsyncadd (%p1538_p11), [#allocation3], 4294965248 }
  0x20   : > { %1373 = dma.done.wait (%p1538_p11), [#allocation6], 512  }
  0x21   : > { %1375 = vsyncadd (%p1538_p11), [#allocation6], 4294966784  ;;  %p551_p0 = scmp.lt.s32.totalorder %s1394_s28, 1  ;;  %v1408_v0 = vmov 0   ;;  %v645_v1 = vld [vmem:[#allocation5 + $0x10] sm:$0xff]  ;;  %v646_v2 = vld [vmem:[#allocation5 + $0x18] sm:$0xff] }
  0x22   : > { %1255 = vset.pattern.permute.xlu0 %v1408_v0  ;;  %v595_v3 = vld [vmem:[#allocation2 + $0x70] sm:$0xff]  ;;  %666 = vmatpush.msra.mxu2 %v645_v1  ;;  %v596_v4 = vld [vmem:[#allocation2 + $0x78] sm:$0xff]  ;;  %v643_v5 = vld [vmem:[#allocation5] sm:$0xff]  ;;  %vm648_vm0 = vcmask 130048   ;;  %vm598_vm1 = vcmask 523264   ;;  %vm696_vm2 = vcmask 1043456  }
  0x23   : > { %s552_s25 = scalar_select %p551_p0, %s1394_s28, 1  ;;  %686 = vmatpush.msra.mxu3 %v646_v2  ;;  %v644_v6 = vld [vmem:[#allocation5 + $0x8] sm:$0xff]  ;;  %610 = vmatpush.msra.mxu0 %v595_v3  ;;  %v593_v8 = vld [vmem:[#allocation2 + $0x60] sm:$0xff]  ;;  %v591_v10 = vld [vmem:[#allocation2 + $0x50] sm:$0xff]  ;;  %vm692_vm3 = vcmask 31744  }
  0x24   : > { %630 = vmatpush.msra.mxu1 %v596_v4  ;;  %v594_v9 = vld [vmem:[#allocation2 + $0x68] sm:$0xff]  ;;  %667 = vmatpush.msra.mxu2 %v643_v5  ;;  %v592_v11 = vld [vmem:[#allocation2 + $0x58] sm:$0xff]  ;;  %v589_v12 = vld [vmem:[#allocation2 + $0x40] sm:$0xff]  ;;  %s548_s16 = sand.u32 1, %s1386_s26  }
  0x25   : > { %s1564_s27 = sshll.u32 %s552_s25, 2  ;;  %687 = vmatpush.msra.mxu3 %v644_v6  ;;  %611 = vmatpush.msra.mxu0 %v593_v8  ;;  %v590_v13 = vld [vmem:[#allocation2 + $0x48] sm:$0xff]  ;;  %v793_v14 = vld [vmem:[%s1666_s6] sm:$0xff]  ;;  %v587_v15 = vld [vmem:[#allocation2 + $0x30] sm:$0xff] }
  0x26   : > { %s564_s20 = scalar_lea.vmem %s1661_s1, %s1564_s27  ;;  %631 = vmatpush.msra.mxu1 %v594_v9  ;;  %s578_s23 = scalar_lea.vmem %s1663_s3, %s1564_s27  ;;  %v588_v16 = vld [vmem:[#allocation2 + $0x38] sm:$0xff]  ;;  %796 = vst [vmem:[#allocation1] ss:$2 sm:$0xff] %v793_v14  ;;  %v585_v18 = vld [vmem:[#allocation2 + $0x20] sm:$0xff]  ;;  %v586_v19 = vld [vmem:[#allocation2 + $0x28] sm:$0xff] }
  0x27   : > { %v642_v7 = vld [vmem:[%s564_s20] sm:$0xf]  ;;  %612 = vmatpush.msra.mxu0 %v591_v10  ;;  %v583_v20 = vld [vmem:[#allocation2 + $0x10] sm:$0xff]  ;;  %s557_s24 = scalar_lea.vmem %s1660_s0, %s1564_s27  ;;  %v581_v22 = vld [vmem:[#allocation2] sm:$0xff]  ;;  %s571_s21 = scalar_lea.vmem %s1662_s2, %s1564_s27 }
  0x28   : > { %1148 = vmatmul.msk.f32.vlgmr.msra.gmra.mxu2 %vm648_vm0, %v642_v7  ;;  %1149 = vmatmul.msk.f32.vlgmr.msra.gmra.mxu3 %vm648_vm0, %v642_v7  ;;  %v897_v17 = vld [vmem:[%s578_s23] sm:$0xf]  ;;  %v582_v23 = vld [vmem:[#allocation2 + $0x8] sm:$0xff]  ;;  %s1141_s20 = sshll.u32 %s548_s16, 4 }
  0x29   : > { %632 = vmatpush.msra.mxu1 %v592_v11  ;;  %613 = vmatpush.msra.mxu0 %v589_v12  ;;  %v584_v21 = vld [vmem:[#allocation2 + $0x18] sm:$0xff]  ;;  %s550_s19 = scalar_lea.vmem [#allocation7], %s1141_s20  ;;  %s1336_s20 = scalar_lea.hbm %s1673_s13, 32 }
  0x2a   : > { %902 = vperm.xlu0 %1255, %v897_v17   ;;  %v580_v24 = vld [vmem:[%s557_s24] sm:$0xf]  ;;  %s989_s27 = sshll.u32 %s550_s19, 4  ;;  %s990_s27 = int_to_ptr.vmem [resolvable:$true] %s989_s27 }
  0x2b   : > { %633 = vmatpush.msra.mxu1 %v590_v13  ;;  %614 = vmatpush.msra.mxu0 %v587_v15  ;;  %v963_v27 = vld [vmem:[%s1672_s12] sm:$0xff] }
  0x2c   : > { %v792_v28 = vld [vmem:[%s571_s21] sm:$0xf]  ;;  %s1175_s21 = sshll.u32 %s1394_s28, 4  ;;  %s974_s28 = scalar_lea.sflag [#allocation4], %s548_s16 }
  0x2d   : > { %634 = vmatpush.msra.mxu1 %v588_v16  ;;  %615 = vmatpush.msra.mxu0 %v585_v18  ;;  %v797_v25 = vld.sshfl [vmem:[#allocation1] sm:$0xff pattern:$0x75316420]  ;;  %v798_v26 = vld.sshfl [vmem:[#allocation1 + $0x8] sm:$0xff pattern:$0x75316420]  ;;  %s987_s15 = scalar_lea.hbm %s1673_s13, %s1175_s21 }
  0x2e   : > { %v898_v29 = vld [vmem:[%s1667_s7] sm:$0x3]  ;;  %s991_s17 = sshll.u32 %s987_s15, 4  ;;  %s992_s17 = int_to_ptr.hbm [resolvable:$true] %s991_s17 }
  0x2f   : > { %635 = vmatpush.msra.mxu1 %v586_v19  ;;  %616 = vmatpush.msra.mxu0 %v583_v20  ;;  %v906_v30 = vperm.slane %v898_v29, 0  ;;  %v907_v31 = vperm.slane %v898_v29, 1  ;;  %v899_v35 = vld [vmem:[%s1671_s11] sm:$0xff]  ;;  %s1330_s14 = sshra.s32 %s992_s17, 4  ;;  %s1331_s14 = int_to_ptr.hbm [resolvable:$true] %s1330_s14 }
  0x30   : > { %v647_v36 = vld [vmem:[%s1669_s9] sm:$0xff]  ;;  %s1332_s24 = scalar_lea.hbm %s1331_s14, 16  ;;  %p1337_p5 = scmp.lt.s32.totalorder %s1331_s14, %s1673_s13 }
  0x31   : > { %636 = vmatpush.msra.mxu1 %v584_v21  ;;  %617 = vmatpush.msra.mxu0 %v581_v22  ;;  %v597_v39 = vld [vmem:[%s1668_s8] sm:$0xff]  ;;  %p1333_p1 = scmp.ne.s32.totalorder %s1331_s14, %s1332_s24  ;;  %p1338_p6 = scmp.lt.s32.totalorder %s1336_s20, %s1332_s24 }
  0x32   : > { %1146 = vmatmul.msk.f32.vlgmr.msra.gmra.mxu0 %vm598_vm1, %v580_v24  ;;  %966 = vperm.xlu0 %1255, %v963_v27   ;;  %v794_v42 = vld [vmem:[%s1670_s10] sm:$0xff] }
  0x33   : > { %637 = vmatpush.msra.mxu1 %v582_v23  ;;  %1158 = vmatpush.msk.msrb.mxu0 %vm696_vm2, %v797_v25  ;;  %p1334_p2 = pnand %p1333_p1, %p1519_p4  ;;  %p1339_p7 = por %p1338_p6, %p1337_p5 }
  0x34   : > { %1147 = vmatmul.msk.f32.vlgmr.msra.gmra.mxu1 %vm598_vm1, %v580_v24 }
  0x35   : > { %1160 = vmatpush.msk.msrb.mxu1 %vm696_vm2, %v798_v26  ;;  %p1335_p3 = pneg %p1334_p2 }
  0x37   : > { %p1340_p9 = pnand %p1339_p7, %p1335_p3 }
  0x3a   : > { %1159 = vmatmul.msk.f32.vlgmr.msrb.gmra.mxu0 %vm692_vm3, %v792_v28 }
  0x3c   : > { %1161 = vmatmul.msk.f32.vlgmr.msrb.gmra.mxu1 %vm692_vm3, %v792_v28 }
  0x9c   : > { %v903_v32 = vpop.permute.xlu0 %902 }
  0x9d   : > { %v910_v33 = vmul.f32 %v906_v30, %v903_v32  ;;  %v911_v34 = vmul.f32 %v907_v31, %v903_v32 }
  0x9f   : > { %1166 = vmatpush.msk.msra.mxu0 %vm696_vm2, %v910_v33  ;;  %1168 = vmatpush.msk.msra.mxu1 %vm696_vm2, %v911_v34 }
  0xa0   : > { %1167 = vmatmul.msk.f32.vlgmr.msra.gmra.mxu0 %vm692_vm3, %v899_v35  ;;  %1169 = vmatmul.msk.f32.vlgmr.msra.gmra.mxu1 %vm692_vm3, %v899_v35 }
  0xa4   : > { %v967_v59 = vpop.permute.xlu0 %966 }
  0xab   : > { %v669_v37 = vpop.f32.mrf.mxu2  ;;  %v689_v38 = vpop.f32.mrf.mxu3 }
  0xac   : > { %1150 = vmatpush.msk.msrb.mxu2 %vm696_vm2, %v669_v37  ;;  %1152 = vmatpush.msk.msrb.mxu3 %vm696_vm2, %v689_v38 }
  0xad   : > { %1151 = vmatmul.msk.f32.vlgmr.msrb.gmra.mxu2 %vm692_vm3, %v647_v36  ;;  %1153 = vmatmul.msk.f32.vlgmr.msrb.gmra.mxu3 %vm692_vm3, %v647_v36 }
  0xaf   : > { %v619_v40 = vpop.f32.mrf.mxu0 }
  0xb0   : > { %1154 = vmatpush.msk.msra.mxu2 %vm696_vm2, %v619_v40 }
  0xb1   : > { %v639_v41 = vpop.f32.mrf.mxu1 }
  0xb2   : > { %1156 = vmatpush.msk.msra.mxu3 %vm696_vm2, %v639_v41 }
  0xb5   : > { %1155 = vmatmul.msk.f32.vlgmr.msra.gmra.mxu2 %vm692_vm3, %v597_v39  ;;  %1157 = vmatmul.msk.f32.vlgmr.msra.gmra.mxu3 %vm692_vm3, %v597_v39 }
  0xb7   : > { %v823_v43 = vpop.f32.mrf.mxu0 }
  0xb8   : > { %1162 = vmatpush.msk.msrb.mxu2 %vm696_vm2, %v823_v43 }
  0xb9   : > { %v843_v44 = vpop.f32.mrf.mxu1 }
  0xba   : > { %1164 = vmatpush.msk.msrb.mxu3 %vm696_vm2, %v843_v44 }
  0xbd   : > { %1163 = vmatmul.msk.f32.vlgmr.msrb.gmra.mxu2 %vm692_vm3, %v794_v42  ;;  %1165 = vmatmul.msk.f32.vlgmr.msrb.gmra.mxu3 %vm692_vm3, %v794_v42 }
 0x11d   : > { %v938_v51 = vpop.f32.mrf.mxu0  ;;  %v958_v52 = vpop.f32.mrf.mxu1 }
 0x130   : > { %v720_v45 = vpop.f32.mrf.mxu2  ;;  %v740_v46 = vpop.f32.mrf.mxu3 }
 0x138   : > { %v769_v47 = vpop.f32.mrf.mxu2  ;;  %v789_v48 = vpop.f32.mrf.mxu3 }
 0x139   : > { %v770_v49 = vadd.f32 %v769_v47, %v720_v45  ;;  %v790_v50 = vadd.f32 %v789_v48, %v740_v46 }
 0x140   : > { %v872_v53 = vpop.f32.mrf.mxu2  ;;  %v892_v54 = vpop.f32.mrf.mxu3 }
 0x141   : > { %v895_v55 = vadd.f32 %v872_v53, %v770_v49  ;;  %v896_v56 = vadd.f32 %v892_v54, %v790_v50 }
 0x143   : > { %v961_v57 = vadd.f32 %v938_v51, %v895_v55  ;;  %v962_v58 = vadd.f32 %v958_v52, %v896_v56 }
 0x145   : > { %v969_v60 = vadd.f32 %v967_v59, %v961_v57  ;;  %v970_v61 = vadd.f32 %v967_v59, %v962_v58 }
 0x147   : > { %971 = vst [vmem:[%s550_s19] sm:$0xff] %v969_v60 }
 0x148   : > { %972 = vst [vmem:[%s550_s19 + $0x8] sm:$0xff] %v970_v61 }
 0x149   : > { %1343 = shalt.err (!%p1340_p9)
}
 0x14a   : > { %1184 = dma.vmem_to_hbm [thread:$0]  (%p1519_p4), %s990_s27, 256, %s992_s17, %s974_s28  }
 0x14b PF: > { %s1689_s16 = sld [smem:[#allocation11_spill]]  ;;  %p1201_p10 = scmp.ge.s32.totalorder %s1402_s30, 2 }
 0x14d   : > { %p1194_p11 = pnand %p1201_p10, %p1526_p8 }
 0x14f   : > { %p1195_p12 = pneg %p1194_p11 }
 0x151   : > { %s1003_s15 = sand.u32 1, %s1689_s16  }
 0x152   : > { %s1004_s19 = scalar_lea.sflag [#allocation4], %s1003_s15 }
 0x153   : > { %1377 = dma.done.wait (%p1195_p12), %s1004_s19, 256  }
 0x154   : > { %1379 = vsyncadd (%p1195_p12), %s1004_s19, 4294967040  ;;  %s28_s30 = sadd.s32 1, %s1402_s30   ;;  %s1691_s14 = sld [smem:[#allocation12_spill]] }
 0x155   : > { %p25_p13 = scmp.ge.s32.totalorder %s28_s30, 4   ;;  %s1692_s27 = sld [smem:[#allocation16_spill]] }
 0x156   : > { %s1693_s28 = sld [smem:[#allocation13_spill]]  ;;  %s1695_s25 = smov %s1386_s26 }
 0x157   : > { %s1694_s29 = sld [smem:[#allocation14_spill]]  ;;  %27 = sbr.rel (!%p25_p13) target bundleno = 6 (0x6), region = 125 }
 0x15a   : > { %s1696_s26 = smov %s1691_s14 }
 0x15c   :  { %1010 = vsyncpa [#allocation3], 1 }
 0x15d   :  { %1012 = vsyncpa [#allocation3 + $0x1], 1 }
 0x15e   :  { %1013 = vsyncpa [#allocation6], 1 }
 0x15f   :  { %1014 = vsyncpa [#allocation4], 1 }
 0x160   :  { %1016 = vsyncpa [#allocation4 + $0x1], 1 }

</bundles_post_ra>
